<compile_context>
chip_gen: v6e
topology: v6e:2x2x1
jax: 0.10.0
libtpu: 0.0.40
codegen_flags: <defaults>
</compile_context>

<pallas_src>
import functools

import jax
import jax.numpy as jnp
import numpy as np
from jax.experimental import pallas as pl
from jax.experimental.pallas import tpu as pltpu


def _round_up(v, m):
    return ((v + m - 1) // m) * m


def _make_kernel(nb, tile_mt, jc, tail_rows):
    """tail_rows: valid rows in the last MT tile (== tile_mt when MT % tile_mt == 0)."""

    def kernel(x_ref, wf_ref, b_ref, o_ref, acc_ref):
        # x_ref:   (NB, TILE_MT, J*C)  current clip-group, one M*T tile
        # wf_ref:  (J*C, Hp)           fused (block-diag backbone) @ fc1 weight, pre-scaled by 1/(M*T)
        # b_ref:   (1, Hp)             fc1 bias (hidden padded to 128 lanes)
        # o_ref:   (NB, 1, Hp)         per-clip output block (VMEM-resident across the MT axis)
        # acc_ref: (NB, J*C) f32       running sum over M*T
        k = pl.program_id(1)
        nk = pl.num_programs(1)

        @pl.when(k == 0)
        def _init():
            acc_ref[...] = jnp.zeros_like(acc_ref)

        if tail_rows == tile_mt:
            # MT divides evenly into tiles: every tile is full, no masking needed.
            acc_ref[...] += jnp.sum(x_ref[...], axis=1)
        else:
            @pl.when(k < nk - 1)
            def _full_tile():
                acc_ref[...] += jnp.sum(x_ref[...], axis=1)

            @pl.when(k == nk - 1)
            def _tail_tile():
                rows = jax.lax.broadcasted_iota(jnp.int32, (nb, tile_mt, jc), 1)
                xv = jnp.where(rows < tail_rows, x_ref[...], 0.0)
                acc_ref[...] += jnp.sum(xv, axis=1)

        @pl.when(k == nk - 1)
        def _finalize():
            # mean over (M, T) is folded into wf (1/MT pre-scale); backbone + fc1 fused.
            y = jnp.dot(acc_ref[...], wf_ref[...], preferred_element_type=jnp.float32) + b_ref[...]
            # F.normalize(dim=-1, eps=1e-12)  ==  y * rsqrt(max(||y||^2, eps^2))
            ssq = jnp.sum(y * y, axis=-1, keepdims=True)
            o_ref[:, 0, :] = y * jax.lax.rsqrt(jnp.maximum(ssq, 1e-24))

    return kernel


def action_net_forward(x, wb, w1, b1, *, dim_rep, hidden_dim, tile_mt=1024, max_nb=8):
    """x: (N, M, T, J, C) f32 -> (N, hidden_dim) f32 (L2-normalized rows)."""
    N, M, T, J, C = x.shape
    MT = M * T
    JC = J * C
    hp = _round_up(hidden_dim, 128)        # lane-dense, unmasked output store

    # Clips per grid step: largest divisor of N (<= max_nb) that still leaves >= 2 blocks on the
    # "parallel" axis (keeps both v7x TensorCores busy); falls back to 1.
    nb = 1
    for cand in sorted({c for c in (max_nb, 8, 4, 2) if 1 <= c <= max_nb}, reverse=True):
        if N % cand == 0 and N // cand >= 2:
            nb = cand
            break

    # MT tiling: never larger than MT (no over-hanging block); otherwise a multiple of 8 and the
    # final (possibly partial) tile is masked inside the kernel.
    tile_mt = max(8, _round_up(min(tile_mt, 2048), 8))
    tile = MT if MT <= tile_mt else tile_mt
    num_k = -(-MT // tile)
    tail_rows = MT - (num_k - 1) * tile

    # (N, M, T, J, C) -> (N, M*T, J*C): pure row-major relabel (no HBM copy), j-major / c-minor.
    x3 = x.reshape(N, MT, JC)

    # Fused weight: kron(I_J, wb) @ w1 * (1/MT), built without the block-diagonal intermediate.
    if hp != hidden_dim:
        w1p = jnp.pad(w1, ((0, 0), (0, hp - hidden_dim)))
        b1p = jnp.pad(b1, (0, hp - hidden_dim))
    else:
        w1p, b1p = w1, b1
    wf = jnp.einsum("cd,jdh->jch", wb, w1p.reshape(J, dim_rep, hp)).reshape(JC, hp)
    wf = (wf * (1.0 / MT)).astype(jnp.float32)
    b1p = b1p.reshape(1, hp).astype(jnp.float32)

    grid = (N // nb, num_k)
    out = pl.pallas_call(
        _make_kernel(nb, tile, JC, tail_rows),
        out_shape=jax.ShapeDtypeStruct((N, 1, hp), jnp.float32),
        grid=grid,
        in_specs=[
            pl.BlockSpec((nb, tile, JC), lambda n, k: (n, k, 0)),   # x tile (pipelined)
            pl.BlockSpec((JC, hp), lambda n, k: (0, 0)),            # fused weight (resident)
            pl.BlockSpec((1, hp), lambda n, k: (0, 0)),             # bias (resident)
        ],
        out_specs=pl.BlockSpec((nb, 1, hp), lambda n, k: (n, 0, 0)),
        scratch_shapes=[pltpu.VMEM((nb, JC), jnp.float32)],
        compiler_params=pltpu.CompilerParams(
            dimension_semantics=("parallel", "arbitrary"),
            vmem_limit_bytes=32 * 1024 * 1024,
        ),
    )(x3, wf, b1p)

    return out.reshape(N, hp)[:, :hidden_dim]


def _reference_forward(x, wb, w1, b1):
    """Pure-JAX re-statement of the PyTorch ActionNet forward (backbone-first order)."""
    N, M, T, J, C = x.shape
    rep = x.reshape(N * M, T, J, C) @ wb                          # backbone.get_representation
    rep = rep.reshape(N, M, T, J, -1)
    pooled = jnp.transpose(rep, (0, 1, 3, 4, 2)).mean(axis=-1)    # mean over T
    v = pooled.reshape(N, M, -1).mean(axis=1)                     # mean over M
    y = v @ w1 + b1                                               # fc1 (dropout p=0.0 is identity)
    nrm = jnp.linalg.norm(y, axis=-1, keepdims=True)
    return y / jnp.maximum(nrm, 1e-12)                            # F.normalize


if __name__ == "__main__":
    key = jax.random.PRNGKey(0)
    k_x, k_wb, k_w1, k_b1, k_x2 = jax.random.split(key, 5)

    # Small shapes consistent with the module's (N, M, T, J, C) input, C=3 pose coords.
    J, C = 17, 3
    dim_rep, hidden_dim = 32, 64

    # Deterministic synthetic parameters (no checkpoint loading).
    wb = jax.random.normal(k_wb, (C, dim_rep), dtype=jnp.float32) * (1.0 / np.sqrt(C))
    w1 = jax.random.normal(k_w1, (J * dim_rep, hidden_dim), dtype=jnp.float32) * (1.0 / np.sqrt(J * dim_rep))
    b1 = jax.random.normal(k_b1, (hidden_dim,), dtype=jnp.float32) * 0.01

    # Case 1: MT fits in one tile, NB=1, 2 blocks on the parallel axis.
    x1 = jax.random.normal(k_x, (2, 2, 8, J, C), dtype=jnp.float32)
    fwd1 = jax.jit(functools.partial(action_net_forward, dim_rep=dim_rep, hidden_dim=hidden_dim))
    out1 = jax.block_until_ready(fwd1(x1, wb, w1, b1))
    np.testing.assert_allclose(np.asarray(out1), np.asarray(_reference_forward(x1, wb, w1, b1)),
                               rtol=2e-3, atol=2e-3)
    assert out1.shape == (2, hidden_dim)

    # Case 2: exercise NB clip-batching and the masked tail MT tile (MT=18, tile=8, NB=2).
    x2 = jax.random.normal(k_x2, (4, 2, 9, J, C), dtype=jnp.float32)
    fwd2 = jax.jit(functools.partial(action_net_forward, dim_rep=dim_rep, hidden_dim=hidden_dim,
                                     tile_mt=8, max_nb=2))
    out2 = jax.block_until_ready(fwd2(x2, wb, w1, b1))
    np.testing.assert_allclose(np.asarray(out2), np.asarray(_reference_forward(x2, wb, w1, b1)),
                               rtol=2e-3, atol=2e-3)
    assert out2.shape == (4, hidden_dim)

    print("KERNEL_OK")
</pallas_src>

<mosaic_0001>
module attributes {stable_mosaic.version = 11 : i64} {
  func.func @kernel(%arg0: i32, %arg1: i32, %arg2: memref<1x16x51xf32, #tpu.memory_space<vmem>>, %arg3: memref<51x128xf32, #tpu.memory_space<vmem>>, %arg4: memref<1x128xf32, #tpu.memory_space<vmem>>, %arg5: memref<1x1x128xf32, #tpu.memory_space<vmem>>, %arg6: memref<1x51xf32, #tpu.memory_space<vmem>>) attributes {dimension_semantics = [#tpu.dimension_semantics<parallel>, #tpu.dimension_semantics<arbitrary>], iteration_bounds = array<i64: 2, 1>, scalar_prefetch = 0 : i64, scratch_operands = 1 : i64, tpu.core_type = #tpu.core_type<tc>, window_params = [{transform_indices = @transform_0, window_bounds = array<i64: 1, 16, 51>}, {pipeline_mode = #tpu.pipeline_mode<synchronous>, transform_indices = @transform_1, window_bounds = array<i64: 51, 128>}, {pipeline_mode = #tpu.pipeline_mode<synchronous>, transform_indices = @transform_2, window_bounds = array<i64: 1, 128>}, {transform_indices = @transform_3, window_bounds = array<i64: 1, 1, 128>}]} {
    %c0_i32 = arith.constant 0 : i32
    %0 = arith.cmpi eq, %arg1, %c0_i32 : i32
    %1 = arith.extui %0 : i1 to i32
    %c0_i32_0 = arith.constant 0 : i32
    %2 = arith.cmpi ne, %1, %c0_i32_0 : i32
    scf.if %2 {
      %cst_9 = arith.constant 0.000000e+00 : f32
      %11 = vector.broadcast %cst_9 : f32 to vector<1x51xf32>
      %c0_10 = arith.constant 0 : index
      %c0_11 = arith.constant 0 : index
      %12 = vector.load %arg6[%c0_10, %c0_11] : memref<1x51xf32, #tpu.memory_space<vmem>>, vector<1x51xf32>
      tpu.vector_store %arg6[%c0_10, %c0_11], %11 {strides = array<i32>} : memref<1x51xf32, #tpu.memory_space<vmem>>, vector<1x51xf32>,
    } else {
    }
    %c0 = arith.constant 0 : index
    %c0_1 = arith.constant 0 : index
    %3 = vector.load %arg6[%c0, %c0_1] : memref<1x51xf32, #tpu.memory_space<vmem>>, vector<1x51xf32>
    %c0_2 = arith.constant 0 : index
    %c0_3 = arith.constant 0 : index
    %c0_4 = arith.constant 0 : index
    %4 = vector.load %arg2[%c0_2, %c0_3, %c0_4] : memref<1x16x51xf32, #tpu.memory_space<vmem>>, vector<1x16x51xf32>
    %cst = arith.constant dense<0.000000e+00> : vector<1x51xf32>
    %5 = vector.multi_reduction <add>, %4, %cst [1] : vector<1x16x51xf32> to vector<1x51xf32>
    %6 = arith.addf %3, %5 : vector<1x51xf32>
    %c0_5 = arith.constant 0 : index
    %c0_6 = arith.constant 0 : index
    %7 = vector.load %arg6[%c0_5, %c0_6] : memref<1x51xf32, #tpu.memory_space<vmem>>, vector<1x51xf32>
    tpu.vector_store %arg6[%c0_5, %c0_6], %6 {strides = array<i32>} : memref<1x51xf32, #tpu.memory_space<vmem>>, vector<1x51xf32>,
    %c0_i32_7 = arith.constant 0 : i32
    %8 = arith.cmpi eq, %arg1, %c0_i32_7 : i32
    %9 = arith.extui %8 : i1 to i32
    %c0_i32_8 = arith.constant 0 : i32
    %10 = arith.cmpi ne, %9, %c0_i32_8 : i32
    scf.if %10 {
      %c0_9 = arith.constant 0 : index
      %c0_10 = arith.constant 0 : index
      %11 = vector.load %arg6[%c0_9, %c0_10] : memref<1x51xf32, #tpu.memory_space<vmem>>, vector<1x51xf32>
      %c0_11 = arith.constant 0 : index
      %c0_12 = arith.constant 0 : index
      %12 = vector.load %arg3[%c0_11, %c0_12] : memref<51x128xf32, #tpu.memory_space<vmem>>, vector<51x128xf32>
      %cst_13 = arith.constant dense<0.000000e+00> : vector<1x128xf32>
      %13 = tpu.matmul %11, %12, %cst_13 {dimension_numbers = #tpu.dot_dimension_numbers<[1], [0], [0], [1], [0, 0, 1, 1], [], []>} : vector<1x51xf32>, vector<51x128xf32>, vector<1x128xf32> -> vector<1x128xf32>
      %c0_14 = arith.constant 0 : index
      %c0_15 = arith.constant 0 : index
      %14 = vector.load %arg4[%c0_14, %c0_15] : memref<1x128xf32, #tpu.memory_space<vmem>>, vector<1x128xf32>
      %15 = arith.addf %13, %14 : vector<1x128xf32>
      %16 = arith.mulf %15, %15 : vector<1x128xf32>
      %cst_16 = arith.constant dense<0.000000e+00> : vector<1xf32>
      %17 = vector.multi_reduction <add>, %16, %cst_16 [1] : vector<1x128xf32> to vector<1xf32>
      %18 = vector.shape_cast %17 : vector<1xf32> to vector<1x1xf32>
      %cst_17 = arith.constant 1.000000e-24 : f32
      %19 = vector.broadcast %cst_17 : f32 to vector<1x1xf32>
      %20 = arith.maximumf %18, %19 : vector<1x1xf32>
      %21 = math.rsqrt %20 : vector<1x1xf32>
      %22 = vector.broadcast %21 : vector<1x1xf32> to vector<1x128xf32>
      %23 = arith.mulf %15, %22 : vector<1x128xf32>
      %c0_18 = arith.constant 0 : index
      %c0_19 = arith.constant 0 : index
      %c0_20 = arith.constant 0 : index
      %24 = vector.load %arg5[%c0_18, %c0_19, %c0_20] : memref<1x1x128xf32, #tpu.memory_space<vmem>>, vector<1x1x128xf32>
      %25 = vector.shape_cast %24 : vector<1x1x128xf32> to vector<1x128xf32>
      %26 = vector.shape_cast %23 : vector<1x128xf32> to vector<1x1x128xf32>
      tpu.vector_store %arg5[%c0_18, %c0_19, %c0_20], %26 {strides = array<i32>} : memref<1x1x128xf32, #tpu.memory_space<vmem>>, vector<1x1x128xf32>,
    } else {
    }
    return
  }
  func.func @transform_0(%arg0: i32, %arg1: i32) -> (i32, i32, i32) {
    %c0_i32 = arith.constant 0 : i32
    %c0_i32_0 = arith.constant 0 : i32
    return %arg0, %arg1, %c0_i32 : i32, i32, i32
  }
  func.func @transform_1(%arg0: i32, %arg1: i32) -> (i32, i32) {
    %c0_i32 = arith.constant 0 : i32
    %c0_i32_0 = arith.constant 0 : i32
    %c0_i32_1 = arith.constant 0 : i32
    return %c0_i32, %c0_i32_0 : i32, i32
  }
  func.func @transform_2(%arg0: i32, %arg1: i32) -> (i32, i32) {
    %c0_i32 = arith.constant 0 : i32
    %c0_i32_0 = arith.constant 0 : i32
    %c0_i32_1 = arith.constant 0 : i32
    return %c0_i32, %c0_i32_0 : i32, i32
  }
  func.func @transform_3(%arg0: i32, %arg1: i32) -> (i32, i32, i32) {
    %c0_i32 = arith.constant 0 : i32
    %c0_i32_0 = arith.constant 0 : i32
    %c0_i32_1 = arith.constant 0 : i32
    return %arg0, %c0_i32, %c0_i32_0 : i32, i32, i32
  }
}

</mosaic_0001>

<bundles_post_ra>
// kernel: action_net_forward.1
= control target key start
LH: loop header
LB: loop body
LE: loop exit
PB: predicated region body
PF: predicated region fallthrough
CT: control target
= control target key end

     0   :  { %8 = vsyncpa [#allocation4], 0  ;;  %s724_s0 = inlined_call_operand.vmem [shape: f32[2,16,51], index: 0, kind: input, shape index: {}]   ;;  %s725_s1 = inlined_call_operand.vmem [shape: f32[51,128], index: 1, kind: input, shape index: {}]   ;;  %s726_s2 = inlined_call_operand.vmem [shape: f32[1,128], index: 2, kind: input, shape index: {}]   ;;  %s727_s3 = inlined_call_operand.hbm [shape: f32[2,1,128], index: 3, kind: output, shape index: {}]  }
   0x1   :  { %10 = vsyncpa [#allocation4 + $0x1], 0  ;;  %s596_s12 = smov 0   ;;  %s598_s13 = smov 0  }
   0x2   :  { %s600_s14 = smov 0   ;;  %s602_s15 = smov 0  }
   0x3   :  { %s604_s16 = smov 0   ;;  %s606_s17 = smov 0  }
   0x4 LB: > { %s398_s18 = sadd.s32 4294967295, %s571_s17   ;;  %s399_s19 = sadd.s32 4294967294, %s571_s17   ;;  %s571_s17 = sphi %s606_s17, %s16_s17   ;;  %s567_s16 = sphi %s604_s16, %s734_s16   ;;  %s563_s15 = sphi %s602_s15, %s733_s15   ;;  %s559_s14 = sphi %s600_s14, %s732_s14   ;;  %s555_s13 = sphi %s598_s13, %s731_s13   ;;  %s551_s12 = sphi %s596_s12, %s730_s12  }
   0x5   : > { %s28_s20 = sadd.s32 1, %s567_s16  ;;  %s105_s21 = sadd.s32 1, %s559_s14 }
   0x6   : > { %p30_p0 = scmp.ge.s32.totalorder %s28_s20, 2  ;;  %p115_p1 = scmp.ne.s32.totalorder %s559_s14, %s555_s13 }
   0x7   : > { %p116_p2 = scmp.eq.s32.totalorder %s398_s18, 1  ;;  %p121_p3 = scmp.ne.s32.totalorder %s555_s13, %s551_s12 }
   0x8   : > { %s736_s20 = smov (%p30_p0, %s28_s20), 0  ;;  %p122_p5 = scmp.eq.s32.totalorder %s399_s19, 1 }
   0x9   : > { %p636_p4 = por %p116_p2, %p115_p1  ;;  %s102_s23 = ssub.s32 %s567_s16, %s736_s20 }
   0xa   : > { %p402_p6 = scmp.ge.s32.totalorder %s571_s17, 1  ;;  %p103_p7 = scmp.eq.s32.totalorder %s102_s23, 0 }
   0xb   : > { %p643_p8 = por %p122_p5, %p121_p3  ;;  %p159_p9 = scmp.lt.s32.totalorder %s571_s17, 3 }
   0xc   : > { %s649_s25 = scalar_select %p103_p7, %s559_s14, %s105_s21  }
   0xd   : > { %p160_p10 = pnand %p402_p6, %p159_p9 }
   0xe   : > { %p187_p11 = scmp.lt.s32.totalorder (!%p160_p10), %s563_s15, 1  ;;  %s184_s30 = sand.u32 (!%p160_p10), 1, %s555_s13  }
   0xf   : > { %163 = sbr.rel (%p160_p10) target bundleno = 418 (0x1a2), region = 32  ;;  %s407_s4 = sshll.u32 (!%p160_p10), %s563_s15, 4 }
  0x10   : > { %s327_s9 = scalar_lea.hbm (!%p160_p10), %s727_s3, %s407_s4  ;;  %s317_s10 = scalar_lea.sflag (!%p160_p10), [#allocation4], %s184_s30 }
  0x11   : > { %s575_s18 = smov (!%p160_p10), [#allocation3]  }
  0x12   : > { %s499_s19 = sshll.u32 (!%p160_p10), %s575_s18, 4  ;;  %s500_s19 = int_to_ptr.vmem [resolvable:$false] %s499_s19 }
  0x14   : > { %v228_v0 = vld [vmem:[%s725_s1 + $0x30] sm:$0x7]  ;;  %vm233_vm0 = vcmask 1042432   ;;  %v573_v1 = vmov 0.0   ;;  %v227_v2 = vld [vmem:[%s725_s1 + $0x28] sm:$0xff]  ;;  %vm200_vm1 = vcmask 409600  }
  0x15   : > { %419 = vmatprep.subr.mxu0 %v573_v1  ;;  %vm574_vm2 = vmmov 0   ;;  %201 = vst.msk [vmem:[#allocation2] sm:$0x1] %vm200_vm1, %v573_v1  ;;  %v226_v3 = vld [vmem:[%s725_s1 + $0x20] sm:$0xff]  ;;  %s188_s5 = scalar_select %p187_p11, %s563_s15, 1  ;;  %v225_v4 = vld [vmem:[%s725_s1 + $0x18] sm:$0xff] }
  0x16   : > { %420 = vmatpush3.msk.msra.mxu0 %vm233_vm0, %v228_v0  ;;  %433 = vmatprep.mubr.msk.f32.mxu0 %vm574_vm2, %v573_v1  ;;  %vm205_vm3 = vcmask 416768   ;;  %v224_v5 = vld [vmem:[%s725_s1 + $0x10] sm:$0xff]  ;;  %v223_v10 = vld [vmem:[%s725_s1 + $0x8] sm:$0xff]  ;;  %v222_v12 = vld [vmem:[%s725_s1] sm:$0xff]  ;;  %vm308_vm4 = vcmask 1040384   ;;  %s501_s15 = scalar_lea.vmem %s500_s19, 32 }
  0x17   : > { %421 = vmatprep.subr.mxu0 %v573_v1  ;;  %s410_s8 = sshll.u32 %s188_s5, 4  ;;  %v229_v22 = vld [vmem:[%s726_s2] sm:$0x1]  ;;  %s185_s5 = scalar_lea.vmem [#allocation3], %s184_s30 }
  0x18   : > { %422 = vmatpush3.msra.mxu0 %v227_v2  ;;  %s194_s11 = scalar_lea.vmem %s724_s0, %s410_s8  ;;  %s329_s6 = sshll.u32 %s185_s5, 4  ;;  %s330_s6 = int_to_ptr.vmem [resolvable:$true] %s329_s6 }
  0x19   : > { %423 = vmatprep.subr.mxu0 %v573_v1  ;;  %v203_v6 = vld [vmem:[%s194_s11] sm:$0xff]  ;;  %v204_v7 = vld [vmem:[%s194_s11 + $0x8] sm:$0xff]  ;;  %s495_s11 = scalar_lea.vmem %s330_s6, 16  ;;  %p502_p1 = scmp.lt.s32.totalorder %s330_s6, %s500_s19 }
  0x1a   : > { %424 = vmatpush3.msra.mxu0 %v226_v3  ;;  %v206_v8 = vsel %vm205_vm3, %v203_v6, 0.0  ;;  %v207_v9 = vsel %vm205_vm3, %v204_v7, 0.0  ;;  %p496_p12 = scmp.ne.s32.totalorder %s330_s6, %s495_s11  ;;  %p503_p2 = scmp.lt.s32.totalorder %s501_s15, %s495_s11 }
  0x1b   : > { %425 = vmatprep.subr.mxu0 %v573_v1  ;;  %v208_v11 = vadd.f32 %v207_v9, %v206_v8 }
  0x1c   : > { %426 = vmatpush3.msra.mxu0 %v225_v4  ;;  %v202_v18 = vld [vmem:[#allocation2] sm:$0x1]  ;;  %p497_p13 = pnand %p496_p12, %p636_p4  ;;  %p504_p3 = por %p503_p2, %p502_p1 }
  0x1d   : > { %427 = vmatprep.subr.mxu0 %v573_v1  ;;  %v209_v13 = vrot.slane %v208_v11, 4 }
  0x1e   : > { %428 = vmatpush3.msra.mxu0 %v224_v5  ;;  %p498_p0 = pneg %p497_p13 }
  0x1f   : > { %429 = vmatprep.subr.mxu0 %v573_v1  ;;  %v210_v14 = vadd.f32 %v209_v13, %v208_v11 }
  0x20   : > { %430 = vmatpush3.msra.mxu0 %v223_v10  ;;  %p505_p5 = pnand %p504_p3, %p498_p0 }
  0x21   : > { %431 = vmatprep.subr.mxu0 %v573_v1  ;;  %v211_v15 = vrot.slane %v210_v14, 2 }
  0x22   : > { %432 = vmatpush3.msra.mxu0 %v222_v12 }
  0x23   : > { %v212_v16 = vadd.f32 %v211_v15, %v210_v14 }
  0x25   : > { %v213_v17 = vrot.slane %v212_v16, 1 }
  0x27   : > { %v214_v19 = vadd.f32 %v213_v17, %v212_v16 }
  0x29   : > { %v215_v20 = vadd.f32 %v214_v19, %v202_v18 }
  0x2b   : > { %217 = vst.msk [vmem:[#allocation2] sm:$0x1] %vm200_vm1, %v215_v20 }
  0x32   : > { %v221_v21 = vld [vmem:[#allocation2] sm:$0x1] }
  0x33   : > { %434 = vmatmul.mubr.msk.f32.vlgmr.msra.gmra.mxu0 %vm205_vm3, %v221_v21 }
  0xf3   : > { %v303_v23 = vpop.f32.mrf.mxu0 }
  0xf4   : > { %v304_v24 = vadd.f32 %v303_v23, %v229_v22 }
  0xf5   : > { %v435_v25 = vpop.f32.mrf.mxu0 }
  0xf6   : > { %v307_v26 = vmul.f32 %v304_v24, %v304_v24 }
  0xf8   : > { %v309_v27 = vsel %vm308_vm4, %v307_v26, 0.0 }
  0xf9   : > { %310 = vadd.xlane.f32.xlu0 %v309_v27 }
 0x182   : > { %v311_v28 = vpop.xlane.xlu0 %310 }
 0x183   : > { %v312_v29 = vmax.f32 %v311_v28, 1e-24 }
 0x185   : > { %493 = vrsqrt.f32 %v312_v29 }
 0x192   : > { %v494_v30 = vpop.eup %493 }
 0x193   : > { %v314_v31 = vmul.f32 %v494_v30, %v304_v24 }
 0x195   : > { %315 = vst [vmem:[%s185_s5] sm:$0x1] %v314_v31 }
 0x196   : > { %508 = shalt.err (!%p505_p5)
}
 0x197   : > { %s509_s21 = scalar_lea.hbm %s327_s9, 16  ;;  %s513_s27 = scalar_lea.hbm %s727_s3, 32 }
 0x198   : > { %p510_p6 = scmp.ne.s32.totalorder %s327_s9, %s509_s21  ;;  %p514_p10 = scmp.lt.s32.totalorder %s327_s9, %s727_s3 }
 0x199   : > { %p515_p11 = scmp.lt.s32.totalorder %s513_s27, %s509_s21 }
 0x19a   : > { %p511_p7 = pnand %p510_p6, %p636_p4 }
 0x19b   : > { %p516_p12 = por %p515_p11, %p514_p10 }
 0x19c   : > { %p512_p9 = pneg %p511_p7 }
 0x19e   : > { %p517_p13 = pnand %p516_p12, %p512_p9 }
 0x1a0   : > { %520 = shalt.err (!%p517_p13)
}
 0x1a1   : > { %436 = dma.vmem_to_hbm [thread:$0]  (%p636_p4), %s330_s6, 16, %s327_s9, %s317_s10  }
 0x1a2 PF: > { %p442_p0 = scmp.ge.s32.totalorder %s571_s17, 2  ;;  %s341_s30 = sand.u32 1, %s551_s12  }
 0x1a3   : > { %s342_s4 = scalar_lea.sflag [#allocation4], %s341_s30 }
 0x1a4   : > { %p439_p1 = pnand %p442_p0, %p643_p8 }
 0x1a6   : > { %p440_p2 = pneg %p439_p1 }
 0x1a8   : > { %546 = dma.done.wait (%p440_p2), %s342_s4, 16  }
 0x1a9   : > { %548 = vsyncadd (%p440_p2), %s342_s4, 4294967280  ;;  %s16_s17 = sadd.s32 1, %s571_s17   ;;  %s730_s12 = smov %s555_s13 }
 0x1aa   : > { %p13_p3 = scmp.ge.s32.totalorder %s16_s17, 4   ;;  %s731_s13 = smov %s559_s14 }
 0x1ab   : > { %s732_s14 = smov %s649_s25  ;;  %s733_s15 = smov %s567_s16 }
 0x1ac   : > { %s734_s16 = smov %s736_s20  ;;  %15 = sbr.rel (!%p13_p3) target bundleno = 4 (0x4), region = 75 }
 0x1b1   :  { %346 = vsyncpa [#allocation4], 1 }
 0x1b2   :  { %348 = vsyncpa [#allocation4 + $0x1], 1 }

</bundles_post_ra>
